<compile_context>
chip_gen: v5e
topology: v5e:2x2
jax: 0.10.0
libtpu: 0.0.40
codegen_flags: <defaults>
</compile_context>

<pallas_src>
import functools

import jax
import jax.numpy as jnp
from jax import lax
from jax.experimental import pallas as pl
from jax.experimental.pallas import tpu as pltpu

_VMEM_LIMIT = 48 * 1024 * 1024  # headroom under v7x's 64 MiB / TC


def _attn_head_kernel(emb_ref, pad_ref,
                      wq_ref, bq_ref, wk_ref, bk_ref, wv_ref, bv_ref,
                      probs_ref, ctx_ref, *, causal):
    """One (batch, head) grid step: per-head QKV projection + masked softmax
    attention. Writes probs (f32) and per-head context (bf16)."""
    L, D = emb_ref.shape[1], emb_ref.shape[2]

    x = emb_ref[0]                              # (L, D) f32
    x_bf = x.astype(jnp.bfloat16)

    # Per-head projections: weights arrive pre-sliced (1, D, dh) in bf16,
    # biases (1, 1, dh) in f32.  MXU accumulates in f32.
    q = jnp.dot(x_bf, wq_ref[0], preferred_element_type=jnp.float32) + bq_ref[0]
    k = jnp.dot(x_bf, wk_ref[0], preferred_element_type=jnp.float32) + bk_ref[0]
    v = jnp.dot(x_bf, wv_ref[0], preferred_element_type=jnp.float32) + bv_ref[0]

    # NOTE: the PyTorch module scales by sqrt(embedding_dim), NOT sqrt(head_dim).
    # Fold the scale into q (L x dh) instead of the (L x L) score matrix.
    inv_scale = 1.0 / (float(D) ** 0.5)
    q = q * inv_scale

    # scores: (L, dh) @ (L, dh)^T -> (L, L), bf16 operands, f32 accumulation.
    s = lax.dot_general(q.astype(jnp.bfloat16), k.astype(jnp.bfloat16),
                        (((1,), (1,)), ((), ())),
                        preferred_element_type=jnp.float32)

    # additive padding mask (broadcast over query rows) + causal set-to(-1e4),
    # matching the PyTorch order: add pad mask first, then masked_fill_.
    s = s + (1.0 - pad_ref[0]) * -10000.0       # pad_ref[0] is (1, L)
    if causal:
        row = lax.broadcasted_iota(jnp.int32, (L, L), 0)
        col = lax.broadcasted_iota(jnp.int32, (L, L), 1)
        s = jnp.where(row >= col, s, -10000.0)

    # softmax over keys, in f32; EUP approx reciprocal for the denominator.
    m = jnp.max(s, axis=-1, keepdims=True)
    e = jnp.exp(s - m)
    p = e * pl.reciprocal(jnp.sum(e, axis=-1, keepdims=True), approx=True)

    probs_ref[0, 0] = p                         # (L, L) f32 attention probs

    # context: (L, L) @ (L, dh), bf16 operands, f32 accumulation.
    ctx = jnp.dot(p.astype(jnp.bfloat16), v.astype(jnp.bfloat16),
                  preferred_element_type=jnp.float32)
    ctx_ref[0, 0] = ctx.astype(ctx_ref.dtype)   # stored bf16
    # TODO(synk): for L >= ~1024 tile the query axis flash-style (online
    # softmax) so the (L, L) score matrix never materializes in full.


def _out_proj_ln_kernel(ctx_ref, emb_ref, wo_ref, bo_ref, gamma_ref, beta_ref,
                        out_ref, *, num_heads):
    """One batch element: 'concat heads' + output projection as a sum of
    per-head matmuls, then residual + LayerNorm(eps=1e-12)."""
    x = emb_ref[0]                              # (L, D) f32

    # sum_h ctx_h @ wo_h  ==  concat(ctx_h) @ wo   (no concat / transpose)
    o = jnp.dot(ctx_ref[0, 0], wo_ref[0], preferred_element_type=jnp.float32)
    for h in range(1, num_heads):
        o = o + jnp.dot(ctx_ref[0, h], wo_ref[h],
                        preferred_element_type=jnp.float32)
    o = o + bo_ref[...]

    y = o + x
    mean = jnp.mean(y, axis=-1, keepdims=True)
    var = jnp.mean((y - mean) ** 2, axis=-1, keepdims=True)
    yn = (y - mean) * lax.rsqrt(var + 1e-12)
    out_ref[0] = (yn * gamma_ref[...] + beta_ref[...]).astype(out_ref.dtype)


def bert_mha_forward(embeddings, padding_mask, params, *, num_heads, causal=True):
    """embeddings: [B, L, D] f32; padding_mask: [B, L] f32 (1=keep, 0=pad).
    Returns (layer_norm(attn_out + embeddings) [B,L,D], attn_probs [B,H,L,L])."""
    B, L, D = embeddings.shape
    assert D % num_heads == 0
    H = num_heads
    dh = D // H

    pad3 = padding_mask.reshape(B, 1, L).astype(jnp.float32)

    # Pre-split weights per head on the host; cast matmul weights to bf16.
    # wq/wk/wv/wo are stored [in, out] (y = x @ W + b).
    split_cols_w = lambda w: w.reshape(D, H, dh).transpose(1, 0, 2).astype(jnp.bfloat16)  # (H, D, dh)
    split_cols_b = lambda b: b.reshape(1, H, dh).transpose(1, 0, 2).astype(jnp.float32)   # (H, 1, dh)
    wq_h, bq_h = split_cols_w(params["wq"]), split_cols_b(params["bq"])
    wk_h, bk_h = split_cols_w(params["wk"]), split_cols_b(params["bk"])
    wv_h, bv_h = split_cols_w(params["wv"]), split_cols_b(params["bv"])
    wo_h = params["wo"].reshape(H, dh, D).astype(jnp.bfloat16)                            # (H, dh, D)

    # ---- kernel 1: per-(batch, head) attention --------------------------------
    attn_kernel = functools.partial(_attn_head_kernel, causal=causal)
    probs, ctx = pl.pallas_call(
        attn_kernel,
        out_shape=(
            jax.ShapeDtypeStruct((B, H, L, L), jnp.float32),
            jax.ShapeDtypeStruct((B, H, L, dh), jnp.bfloat16),
        ),
        grid_spec=pltpu.PrefetchScalarGridSpec(
            num_scalar_prefetch=0,
            grid=(B, H),
            in_specs=[
                pl.BlockSpec((1, L, D), lambda b, h: (b, 0, 0)),    # embeddings
                pl.BlockSpec((1, 1, L), lambda b, h: (b, 0, 0)),    # padding mask
                pl.BlockSpec((1, D, dh), lambda b, h: (h, 0, 0)),   # wq head slice
                pl.BlockSpec((1, 1, dh), lambda b, h: (h, 0, 0)),   # bq head slice
                pl.BlockSpec((1, D, dh), lambda b, h: (h, 0, 0)),   # wk head slice
                pl.BlockSpec((1, 1, dh), lambda b, h: (h, 0, 0)),   # bk head slice
                pl.BlockSpec((1, D, dh), lambda b, h: (h, 0, 0)),   # wv head slice
                pl.BlockSpec((1, 1, dh), lambda b, h: (h, 0, 0)),   # bv head slice
            ],
            out_specs=[
                pl.BlockSpec((1, 1, L, L), lambda b, h: (b, h, 0, 0)),   # probs
                pl.BlockSpec((1, 1, L, dh), lambda b, h: (b, h, 0, 0)),  # per-head ctx
            ],
        ),
        compiler_params=pltpu.CompilerParams(
            dimension_semantics=("parallel", "parallel"),
            vmem_limit_bytes=_VMEM_LIMIT),
    )(embeddings, pad3, wq_h, bq_h, wk_h, bk_h, wv_h, bv_h)

    # ---- kernel 2: output projection + residual + LayerNorm --------------------
    out_kernel = functools.partial(_out_proj_ln_kernel, num_heads=H)
    out = pl.pallas_call(
        out_kernel,
        out_shape=jax.ShapeDtypeStruct((B, L, D), embeddings.dtype),
        grid_spec=pltpu.PrefetchScalarGridSpec(
            num_scalar_prefetch=0,
            grid=(B,),
            in_specs=[
                pl.BlockSpec((1, H, L, dh), lambda b: (b, 0, 0, 0)),  # ctx (bf16)
                pl.BlockSpec((1, L, D), lambda b: (b, 0, 0)),         # embeddings
                pl.BlockSpec((H, dh, D), lambda b: (0, 0, 0)),        # wo per-head
                pl.BlockSpec((1, D), lambda b: (0, 0)),               # bo
                pl.BlockSpec((1, D), lambda b: (0, 0)),               # gamma
                pl.BlockSpec((1, D), lambda b: (0, 0)),               # beta
            ],
            out_specs=pl.BlockSpec((1, L, D), lambda b: (b, 0, 0)),
        ),
        compiler_params=pltpu.CompilerParams(
            dimension_semantics=("parallel",),
            vmem_limit_bytes=_VMEM_LIMIT),
    )(ctx, embeddings, wo_h,
      params["bo"].astype(jnp.float32),
      params["gamma"].astype(jnp.float32),
      params["beta"].astype(jnp.float32))

    return out, probs


def init_params(key, embedding_dim):
    """Deterministic synthetic params. Weights are stored as [in, out]
    (already transposed relative to torch.nn.Linear's [out, in])."""
    D = embedding_dim
    ks = jax.random.split(key, 8)
    std = (2.0 / (D + D)) ** 0.5  # xavier-normal std for a square D x D linear
    xn = lambda k: (jax.random.normal(k, (D, D), jnp.float32) * std)
    bias = lambda k: (jax.random.normal(k, (1, D), jnp.float32) * 0.02)
    return {
        "wq": xn(ks[0]), "bq": bias(ks[1]),
        "wk": xn(ks[2]), "bk": bias(ks[3]),
        "wv": xn(ks[4]), "bv": bias(ks[5]),
        "wo": xn(ks[6]), "bo": bias(ks[7]),
        "gamma": jnp.ones((1, D), jnp.float32),
        "beta": jnp.zeros((1, D), jnp.float32),
    }


def _reference(embeddings, padding_mask, params, num_heads, causal=True):
    """Pure-JAX f32 reference mirroring the PyTorch forward."""
    B, L, D = embeddings.shape
    dh = D // num_heads
    q = embeddings @ params["wq"] + params["bq"]
    k = embeddings @ params["wk"] + params["bk"]
    v = embeddings @ params["wv"] + params["bv"]
    q = q.reshape(B, L, num_heads, dh).transpose(0, 2, 1, 3)
    k = k.reshape(B, L, num_heads, dh).transpose(0, 2, 1, 3)
    v = v.reshape(B, L, num_heads, dh).transpose(0, 2, 1, 3)
    s = jnp.einsum("bhqd,bhkd->bhqk", q, k) / (D ** 0.5)
    s = s + ((1.0 - padding_mask)[:, None, None, :] * -10000.0)
    if causal:
        tril = jnp.tril(jnp.ones((L, L), jnp.float32))
        s = jnp.where(tril[None, None] == 0, -10000.0, s)
    p = jax.nn.softmax(s, axis=-1)
    ctx = jnp.einsum("bhqk,bhkd->bhqd", p, v).transpose(0, 2, 1, 3).reshape(B, L, D)
    o = ctx @ params["wo"] + params["bo"]
    y = o + embeddings
    mean = jnp.mean(y, axis=-1, keepdims=True)
    var = jnp.mean((y - mean) ** 2, axis=-1, keepdims=True)
    yn = (y - mean) / jnp.sqrt(var + 1e-12)
    return yn * params["gamma"] + params["beta"], p


if __name__ == "__main__":
    B, L, D, H = 2, 8, 32, 4     # small shapes: batch=2, seq=8, hidden=32, heads=4

    key = jax.random.PRNGKey(0)
    k_emb, k_par = jax.random.split(key)
    embeddings = jax.random.normal(k_emb, (B, L, D), jnp.float32)
    # padding mask: last two tokens of batch element 1 are padding
    padding_mask = jnp.ones((B, L), jnp.float32).at[1, -2:].set(0.0)

    params = init_params(k_par, D)

    out, probs = bert_mha_forward(embeddings, padding_mask, params,
                                  num_heads=H, causal=True)
    out = jax.block_until_ready(out)
    probs = jax.block_until_ready(probs)

    ref_out, ref_probs = _reference(embeddings, padding_mask, params, H)
    assert out.shape == (B, L, D) and probs.shape == (B, H, L, L)
    # tolerances relaxed for bf16 MXU operands + approx reciprocal
    assert jnp.allclose(out, ref_out, atol=5e-2, rtol=5e-2)
    assert jnp.allclose(probs, ref_probs, atol=2e-2, rtol=2e-2)

    print("KERNEL_OK")
</pallas_src>

<mosaic_0001>
module attributes {stable_mosaic.version = 11 : i64} {
  func.func @_attn_head_kernel(%arg0: i32, %arg1: i32, %arg2: memref<1x8x32xf32, #tpu.memory_space<vmem>>, %arg3: memref<1x1x8xf32, #tpu.memory_space<vmem>>, %arg4: memref<1x32x8xbf16, #tpu.memory_space<vmem>>, %arg5: memref<1x1x8xf32, #tpu.memory_space<vmem>>, %arg6: memref<1x32x8xbf16, #tpu.memory_space<vmem>>, %arg7: memref<1x1x8xf32, #tpu.memory_space<vmem>>, %arg8: memref<1x32x8xbf16, #tpu.memory_space<vmem>>, %arg9: memref<1x1x8xf32, #tpu.memory_space<vmem>>, %arg10: memref<1x1x8x8xf32, #tpu.memory_space<vmem>>, %arg11: memref<1x1x8x8xbf16, #tpu.memory_space<vmem>>) attributes {dimension_semantics = [#tpu.dimension_semantics<parallel>, #tpu.dimension_semantics<parallel>], iteration_bounds = array<i64: 2, 4>, scalar_prefetch = 0 : i64, scratch_operands = 0 : i64, tpu.core_type = #tpu.core_type<tc>, window_params = [{transform_indices = @transform_0, window_bounds = array<i64: 1, 8, 32>}, {transform_indices = @transform_1, window_bounds = array<i64: 1, 1, 8>}, {transform_indices = @transform_2, window_bounds = array<i64: 1, 32, 8>}, {transform_indices = @transform_3, window_bounds = array<i64: 1, 1, 8>}, {transform_indices = @transform_4, window_bounds = array<i64: 1, 32, 8>}, {transform_indices = @transform_5, window_bounds = array<i64: 1, 1, 8>}, {transform_indices = @transform_6, window_bounds = array<i64: 1, 32, 8>}, {transform_indices = @transform_7, window_bounds = array<i64: 1, 1, 8>}, {transform_indices = @transform_8, window_bounds = array<i64: 1, 1, 8, 8>}, {transform_indices = @transform_9, window_bounds = array<i64: 1, 1, 8, 8>}]} {
    %c0 = arith.constant 0 : index
    %c0_0 = arith.constant 0 : index
    %c0_1 = arith.constant 0 : index
    %0 = vector.load %arg2[%c0, %c0_0, %c0_1] : memref<1x8x32xf32, #tpu.memory_space<vmem>>, vector<1x8x32xf32>
    %1 = vector.shape_cast %0 : vector<1x8x32xf32> to vector<8x32xf32>
    %2 = arith.truncf %1 : vector<8x32xf32> to vector<8x32xbf16>
    %c0_2 = arith.constant 0 : index
    %c0_3 = arith.constant 0 : index
    %c0_4 = arith.constant 0 : index
    %3 = vector.load %arg4[%c0_2, %c0_3, %c0_4] : memref<1x32x8xbf16, #tpu.memory_space<vmem>>, vector<1x32x8xbf16>
    %4 = vector.shape_cast %3 : vector<1x32x8xbf16> to vector<32x8xbf16>
    %cst = arith.constant dense<0.000000e+00> : vector<8x8xf32>
    %5 = tpu.matmul %2, %4, %cst {dimension_numbers = #tpu.dot_dimension_numbers<[1], [0], [0], [1], [0, 0, 1, 1], [], []>} : vector<8x32xbf16>, vector<32x8xbf16>, vector<8x8xf32> -> vector<8x8xf32>
    %c0_5 = arith.constant 0 : index
    %c0_6 = arith.constant 0 : index
    %c0_7 = arith.constant 0 : index
    %6 = vector.load %arg5[%c0_5, %c0_6, %c0_7] : memref<1x1x8xf32, #tpu.memory_space<vmem>>, vector<1x1x8xf32>
    %7 = vector.shape_cast %6 : vector<1x1x8xf32> to vector<1x8xf32>
    %8 = vector.broadcast %7 : vector<1x8xf32> to vector<8x8xf32>
    %9 = arith.addf %5, %8 : vector<8x8xf32>
    %c0_8 = arith.constant 0 : index
    %c0_9 = arith.constant 0 : index
    %c0_10 = arith.constant 0 : index
    %10 = vector.load %arg6[%c0_8, %c0_9, %c0_10] : memref<1x32x8xbf16, #tpu.memory_space<vmem>>, vector<1x32x8xbf16>
    %11 = vector.shape_cast %10 : vector<1x32x8xbf16> to vector<32x8xbf16>
    %cst_11 = arith.constant dense<0.000000e+00> : vector<8x8xf32>
    %12 = tpu.matmul %2, %11, %cst_11 {dimension_numbers = #tpu.dot_dimension_numbers<[1], [0], [0], [1], [0, 0, 1, 1], [], []>} : vector<8x32xbf16>, vector<32x8xbf16>, vector<8x8xf32> -> vector<8x8xf32>
    %c0_12 = arith.constant 0 : index
    %c0_13 = arith.constant 0 : index
    %c0_14 = arith.constant 0 : index
    %13 = vector.load %arg7[%c0_12, %c0_13, %c0_14] : memref<1x1x8xf32, #tpu.memory_space<vmem>>, vector<1x1x8xf32>
    %14 = vector.shape_cast %13 : vector<1x1x8xf32> to vector<1x8xf32>
    %15 = vector.broadcast %14 : vector<1x8xf32> to vector<8x8xf32>
    %16 = arith.addf %12, %15 : vector<8x8xf32>
    %c0_15 = arith.constant 0 : index
    %c0_16 = arith.constant 0 : index
    %c0_17 = arith.constant 0 : index
    %17 = vector.load %arg8[%c0_15, %c0_16, %c0_17] : memref<1x32x8xbf16, #tpu.memory_space<vmem>>, vector<1x32x8xbf16>
    %18 = vector.shape_cast %17 : vector<1x32x8xbf16> to vector<32x8xbf16>
    %cst_18 = arith.constant dense<0.000000e+00> : vector<8x8xf32>
    %19 = tpu.matmul %2, %18, %cst_18 {dimension_numbers = #tpu.dot_dimension_numbers<[1], [0], [0], [1], [0, 0, 1, 1], [], []>} : vector<8x32xbf16>, vector<32x8xbf16>, vector<8x8xf32> -> vector<8x8xf32>
    %c0_19 = arith.constant 0 : index
    %c0_20 = arith.constant 0 : index
    %c0_21 = arith.constant 0 : index
    %20 = vector.load %arg9[%c0_19, %c0_20, %c0_21] : memref<1x1x8xf32, #tpu.memory_space<vmem>>, vector<1x1x8xf32>
    %21 = vector.shape_cast %20 : vector<1x1x8xf32> to vector<1x8xf32>
    %22 = vector.broadcast %21 : vector<1x8xf32> to vector<8x8xf32>
    %23 = arith.addf %19, %22 : vector<8x8xf32>
    %cst_22 = arith.constant 0.176776692 : f32
    %24 = vector.broadcast %cst_22 : f32 to vector<8x8xf32>
    %25 = arith.mulf %9, %24 : vector<8x8xf32>
    %26 = arith.truncf %25 : vector<8x8xf32> to vector<8x8xbf16>
    %27 = arith.truncf %16 : vector<8x8xf32> to vector<8x8xbf16>
    %cst_23 = arith.constant dense<0.000000e+00> : vector<8x8xf32>
    %28 = tpu.matmul %26, %27, %cst_23 {dimension_numbers = #tpu.dot_dimension_numbers<[1], [1], [0], [0], [0, 0, 1, 0], [], []>} : vector<8x8xbf16>, vector<8x8xbf16>, vector<8x8xf32> -> vector<8x8xf32>
    %c0_24 = arith.constant 0 : index
    %c0_25 = arith.constant 0 : index
    %c0_26 = arith.constant 0 : index
    %29 = vector.load %arg3[%c0_24, %c0_25, %c0_26] : memref<1x1x8xf32, #tpu.memory_space<vmem>>, vector<1x1x8xf32>
    %30 = vector.shape_cast %29 : vector<1x1x8xf32> to vector<1x8xf32>
    %cst_27 = arith.constant 1.000000e+00 : f32
    %31 = vector.broadcast %cst_27 : f32 to vector<1x8xf32>
    %32 = arith.subf %31, %30 : vector<1x8xf32>
    %cst_28 = arith.constant -1.000000e+04 : f32
    %33 = vector.broadcast %cst_28 : f32 to vector<1x8xf32>
    %34 = arith.mulf %32, %33 : vector<1x8xf32>
    %35 = vector.broadcast %34 : vector<1x8xf32> to vector<8x8xf32>
    %36 = arith.addf %28, %35 : vector<8x8xf32>
    %37 = tpu.iota {dimensions = array<i32: 0>} : vector<8x8xi32>
    %38 = tpu.iota {dimensions = array<i32: 1>} : vector<8x8xi32>
    %39 = arith.cmpi sge, %37, %38 : vector<8x8xi32>
    %cst_29 = arith.constant -1.000000e+04 : f32
    %40 = vector.broadcast %cst_29 : f32 to vector<8x8xf32>
    %41 = arith.select %39, %36, %40 : vector<8x8xi1>, vector<8x8xf32>
    %cst_30 = arith.constant dense<0xFF800000> : vector<8xf32>
    %42 = vector.multi_reduction <maximumf>, %41, %cst_30 [1] : vector<8x8xf32> to vector<8xf32>
    %43 = vector.shape_cast %42 : vector<8xf32> to vector<8x1xf32>
    %44 = vector.broadcast %43 : vector<8x1xf32> to vector<8x8xf32>
    %45 = arith.subf %41, %44 : vector<8x8xf32>
    %46 = math.exp %45 : vector<8x8xf32>
    %cst_31 = arith.constant dense<0.000000e+00> : vector<8xf32>
    %47 = vector.multi_reduction <add>, %46, %cst_31 [1] : vector<8x8xf32> to vector<8xf32>
    %48 = vector.shape_cast %47 : vector<8xf32> to vector<8x1xf32>
    %49 = tpu.reciprocal %48 {approx = true} : vector<8x1xf32> -> vector<8x1xf32>
    %50 = vector.broadcast %49 : vector<8x1xf32> to vector<8x8xf32>
    %51 = arith.mulf %46, %50 : vector<8x8xf32>
    %c0_32 = arith.constant 0 : index
    %c0_33 = arith.constant 0 : index
    %c0_34 = arith.constant 0 : index
    %c0_35 = arith.constant 0 : index
    %52 = vector.load %arg10[%c0_32, %c0_33, %c0_34, %c0_35] : memref<1x1x8x8xf32, #tpu.memory_space<vmem>>, vector<1x1x8x8xf32>
    %53 = vector.shape_cast %52 : vector<1x1x8x8xf32> to vector<8x8xf32>
    %54 = vector.shape_cast %51 : vector<8x8xf32> to vector<1x1x8x8xf32>
    tpu.vector_store %arg10[%c0_32, %c0_33, %c0_34, %c0_35], %54 {strides = array<i32>} : memref<1x1x8x8xf32, #tpu.memory_space<vmem>>, vector<1x1x8x8xf32>,
    %55 = arith.truncf %51 : vector<8x8xf32> to vector<8x8xbf16>
    %56 = arith.truncf %23 : vector<8x8xf32> to vector<8x8xbf16>
    %cst_36 = arith.constant dense<0.000000e+00> : vector<8x8xf32>
    %57 = tpu.matmul %55, %56, %cst_36 {dimension_numbers = #tpu.dot_dimension_numbers<[1], [0], [0], [1], [0, 0, 1, 1], [], []>} : vector<8x8xbf16>, vector<8x8xbf16>, vector<8x8xf32> -> vector<8x8xf32>
    %58 = arith.truncf %57 : vector<8x8xf32> to vector<8x8xbf16>
    %c0_37 = arith.constant 0 : index
    %c0_38 = arith.constant 0 : index
    %c0_39 = arith.constant 0 : index
    %c0_40 = arith.constant 0 : index
    %59 = vector.load %arg11[%c0_37, %c0_38, %c0_39, %c0_40] : memref<1x1x8x8xbf16, #tpu.memory_space<vmem>>, vector<1x1x8x8xbf16>
    %60 = vector.shape_cast %59 : vector<1x1x8x8xbf16> to vector<8x8xbf16>
    %61 = vector.shape_cast %58 : vector<8x8xbf16> to vector<1x1x8x8xbf16>
    tpu.vector_store %arg11[%c0_37, %c0_38, %c0_39, %c0_40], %61 {strides = array<i32>} : memref<1x1x8x8xbf16, #tpu.memory_space<vmem>>, vector<1x1x8x8xbf16>,
    return
  }
  func.func @transform_0(%arg0: i32, %arg1: i32) -> (i32, i32, i32) {
    %c0_i32 = arith.constant 0 : i32
    %c0_i32_0 = arith.constant 0 : i32
    %c0_i32_1 = arith.constant 0 : i32
    return %arg0, %c0_i32, %c0_i32_0 : i32, i32, i32
  }
  func.func @transform_1(%arg0: i32, %arg1: i32) -> (i32, i32, i32) {
    %c0_i32 = arith.constant 0 : i32
    %c0_i32_0 = arith.constant 0 : i32
    %c0_i32_1 = arith.constant 0 : i32
    return %arg0, %c0_i32, %c0_i32_0 : i32, i32, i32
  }
  func.func @transform_2(%arg0: i32, %arg1: i32) -> (i32, i32, i32) {
    %c0_i32 = arith.constant 0 : i32
    %c0_i32_0 = arith.constant 0 : i32
    %c0_i32_1 = arith.constant 0 : i32
    return %arg1, %c0_i32, %c0_i32_0 : i32, i32, i32
  }
  func.func @transform_3(%arg0: i32, %arg1: i32) -> (i32, i32, i32) {
    %c0_i32 = arith.constant 0 : i32
    %c0_i32_0 = arith.constant 0 : i32
    %c0_i32_1 = arith.constant 0 : i32
    return %arg1, %c0_i32, %c0_i32_0 : i32, i32, i32
  }
  func.func @transform_4(%arg0: i32, %arg1: i32) -> (i32, i32, i32) {
    %c0_i32 = arith.constant 0 : i32
    %c0_i32_0 = arith.constant 0 : i32
    %c0_i32_1 = arith.constant 0 : i32
    return %arg1, %c0_i32, %c0_i32_0 : i32, i32, i32
  }
  func.func @transform_5(%arg0: i32, %arg1: i32) -> (i32, i32, i32) {
    %c0_i32 = arith.constant 0 : i32
    %c0_i32_0 = arith.constant 0 : i32
    %c0_i32_1 = arith.constant 0 : i32
    return %arg1, %c0_i32, %c0_i32_0 : i32, i32, i32
  }
  func.func @transform_6(%arg0: i32, %arg1: i32) -> (i32, i32, i32) {
    %c0_i32 = arith.constant 0 : i32
    %c0_i32_0 = arith.constant 0 : i32
    %c0_i32_1 = arith.constant 0 : i32
    return %arg1, %c0_i32, %c0_i32_0 : i32, i32, i32
  }
  func.func @transform_7(%arg0: i32, %arg1: i32) -> (i32, i32, i32) {
    %c0_i32 = arith.constant 0 : i32
    %c0_i32_0 = arith.constant 0 : i32
    %c0_i32_1 = arith.constant 0 : i32
    return %arg1, %c0_i32, %c0_i32_0 : i32, i32, i32
  }
  func.func @transform_8(%arg0: i32, %arg1: i32) -> (i32, i32, i32, i32) {
    %c0_i32 = arith.constant 0 : i32
    %c0_i32_0 = arith.constant 0 : i32
    %c0_i32_1 = arith.constant 0 : i32
    return %arg0, %arg1, %c0_i32, %c0_i32_0 : i32, i32, i32, i32
  }
  func.func @transform_9(%arg0: i32, %arg1: i32) -> (i32, i32, i32, i32) {
    %c0_i32 = arith.constant 0 : i32
    %c0_i32_0 = arith.constant 0 : i32
    %c0_i32_1 = arith.constant 0 : i32
    return %arg0, %arg1, %c0_i32, %c0_i32_0 : i32, i32, i32, i32
  }
}

</mosaic_0001>

<bundles_post_ra>
// kernel: tpu_custom_call.1
= control target key start
LH: loop header
LB: loop body
LE: loop exit
PB: predicated region body
PF: predicated region fallthrough
CT: control target
= control target key end

     0   :  { %15 = vsyncpa [#allocation3], 0  ;;  %s1374_s0 = inlined_call_operand.vmem [shape: f32[2,8,32], index: 0, kind: input, shape index: {}]   ;;  %s1375_s1 = inlined_call_operand.vmem [shape: f32[2,1,8], index: 1, kind: input, shape index: {}]   ;;  %s1376_s2 = inlined_call_operand.vmem [shape: bf16[4,32,8], index: 2, kind: input, shape index: {}]   ;;  %s1377_s3 = inlined_call_operand.vmem [shape: f32[4,1,8], index: 3, kind: input, shape index: {}]   ;;  %s1378_s4 = inlined_call_operand.vmem [shape: bf16[4,32,8], index: 4, kind: input, shape index: {}]   ;;  %s1379_s5 = inlined_call_operand.vmem [shape: f32[4,1,8], index: 5, kind: input, shape index: {}]   ;;  %s1380_s6 = inlined_call_operand.vmem [shape: bf16[4,32,8], index: 6, kind: input, shape index: {}]   ;;  %s1381_s7 = inlined_call_operand.vmem [shape: f32[4,1,8], index: 7, kind: input, shape index: {}]   ;;  %s1382_s8 = inlined_call_operand.hbm [shape: f32[2,4,8,8], index: 8, kind: output, shape index: {0}]   ;;  %s1383_s9 = inlined_call_operand.hbm [shape: bf16[2,4,8,8], index: 9, kind: output, shape index: {1}]  }
   0x1   :  { %17 = vsyncpa [#allocation3 + $0x1], 0 }
   0x2   :  { %18 = vsyncpa [#allocation5], 0 }
   0x3   :  { %20 = vsyncpa [#allocation5 + $0x1], 0  ;;  %s1188_s30 = smov 0   ;;  %s1190_s10 = smov 0  }
   0x4   :  { %s1192_s11 = smov 0   ;;  %s1194_s12 = smov 0  }
   0x5   :  { %s1196_s13 = smov 0   ;;  %s1198_s14 = smov 0  }
   0x6   :  { %s1200_s15 = smov 0   ;;  %s1202_s16 = smov 0  }
   0x7 LB: > { %1391 = sst [smem:[#allocation8_spill]] %s1108_s30  ;;  %s867_s17 = sadd.s32 4294967295, %s1136_s16   ;;  %s1136_s16 = sphi %s1202_s16, %s26_s16   ;;  %s1132_s15 = sphi %s1200_s15, %s1408_s15   ;;  %s1128_s14 = sphi %s1198_s14, %s1407_s14   ;;  %s1124_s13 = sphi %s1196_s13, %s1406_s13   ;;  %s1120_s12 = sphi %s1194_s12, %s1405_s12   ;;  %s1116_s11 = sphi %s1192_s11, %s1404_s11   ;;  %s1112_s10 = sphi %s1190_s10, %s1410_s10   ;;  %s1108_s30 = sphi %s1188_s30, %s1409_s30  }
   0x8   : > { %1392 = sst [smem:[#allocation9_spill]] %s1116_s11  ;;  %s868_s18 = sadd.s32 4294967294, %s1136_s16  }
   0x9   : > { %1393 = sst [smem:[#allocation10_spill]] %s1128_s14  ;;  %s35_s19 = sadd.s32 1, %s1128_s14 }
   0xa   : > { %1394 = sst [smem:[#allocation11_spill]] %s1132_s15  ;;  %p36_p0 = scmp.ge.s32.totalorder %s35_s19, 4 }
   0xb   : > { %s38_s20 = sadd.s32 1, %s1132_s15  ;;  %p265_p1 = scmp.ne.s32.totalorder %s1116_s11, %s1112_s10 }
   0xc   : > { %p266_p2 = scmp.eq.s32.totalorder %s867_s17, 7  ;;  %s1412_s19 = smov (%p36_p0, %s35_s19), 0 }
   0xd   : > { %1395 = sst [smem:[#allocation12_spill]] %s1412_s19  ;;  %s1414_s20 = smov (!%p36_p0, %s38_s20), %s1132_s15 }
   0xe   : > { %s251_s21 = ssub.s32 %s1128_s14, %s1412_s19  ;;  %p1239_p3 = por %p266_p2, %p265_p1 }
   0xf   : > { %p40_p4 = scmp.ge.s32.totalorder %s1414_s20, 2  ;;  %p271_p5 = scmp.ne.s32.totalorder %s1112_s10, %s1108_s30 }
  0x10   : > { %p272_p6 = scmp.eq.s32.totalorder %s868_s18, 7  ;;  %p871_p7 = scmp.ge.s32.totalorder %s1136_s16, 1 }
  0x11   : > { %s1416_s20 = smov (%p40_p4, %s1414_s20), 0  ;;  %p373_p9 = scmp.lt.s32.totalorder %s1136_s16, 9 }
  0x12   : > { %1397 = sst [smem:[#allocation13_spill]] %s1416_s20  ;;  %p1248_p8 = por %p272_p6, %p271_p5 }
  0x13   : > { %s250_s24 = ssub.s32 %s1132_s15, %s1416_s20  ;;  %s255_s25 = sadd.s32 1, %s1116_s11 }
  0x14   : > { %s1398_s23 = scalar_select %p1248_p8, 1, 0 }
  0x15   : > { %s252_s26 = sor.u32 %s251_s21, %s250_s24  ;;  %p374_p10 = pnand %p871_p7, %p373_p9 }
  0x16   : > { %1399 = sst [smem:[#allocation14_spill]] %s1398_s23  ;;  %p253_p11 = scmp.eq.s32.totalorder %s252_s26, 0 }
  0x17   : > { %377 = sbr.rel (%p374_p10) target bundleno = 704 (0x2c0), region = 52  ;;  %p447_p12 = scmp.lt.s32.totalorder (!%p374_p10), %s1120_s12, 3 }
  0x18   : > { %s1257_s27 = scalar_select %p253_p11, %s1116_s11, %s255_s25  }
  0x19   : > { %p440_p13 = scmp.lt.s32.totalorder (!%p374_p10), %s1124_s13, 1  ;;  %s912_s26 = sshll.u32 (!%p374_p10), %s1124_s13, 2 }
  0x1a   : > { %1400 = sst [smem:[#allocation15_spill]] %s1257_s27  ;;  %s665_s18 = sadd.s32 (!%p374_p10), %s1120_s12, %s912_s26 }
  0x1b   : > { %s913_s21 = sshll.u32 (!%p374_p10), %s665_s18, 3 }
  0x1c   : > { %s1262_s28 = scalar_select %p447_p12, %s1120_s12, 3  ;;  %vm494_vm0 = vcmask 261120   ;;  %vm586_vm1 = vcmask 64512   ;;  %v606_v22 = vlaneseq  ;;  %vm629_vm3 = vcmask 1043456  }
  0x1d   : > { %s1265_s29 = scalar_select %p440_p13, %s1124_s13, 1 }
  0x1e   : > { %s1268_s17 = sshll.u32 %s1262_s28, 4  ;;  %s454_s24 = scalar_lea.vmem %s1377_s3, %s1262_s28  ;;  %v607_v24 = vshrl.u32 %v606_v22, 7  ;;  %v609_v25 = vand.u32 127, %v606_v22 }
  0x1f   : > { %s451_s20 = scalar_lea.vmem %s1376_s2, %s1268_s17  ;;  %s459_s14 = scalar_lea.vmem %s1378_s4, %s1268_s17  ;;  %v1003_v6 = vld [vmem:[%s454_s24] ss:$0 sm:$0xff] }
  0x20   : > { %v922_v0 = vld [vmem:[%s451_s20 + $0x8] sm:$0xff]  ;;  %s874_s27 = sshll.u32 %s1265_s29, 3  ;;  %v921_v2 = vld [vmem:[%s451_s20] sm:$0xff]  ;;  %s462_s25 = scalar_lea.vmem %s1379_s5, %s1262_s28  ;;  %vm610_vm2 = vcmp.ge.s32.totalorder %v607_v24, %v609_v25 }
  0x21   : > { %v924_v1 = vld [vmem:[%s459_s14 + $0x8] sm:$0xff]  ;;  %s443_s30 = scalar_lea.vmem %s1374_s0, %s874_s27  ;;  %504 = vmatpush.bf16.msra.mxu0 %v922_v0  ;;  %v923_v3 = vld [vmem:[%s459_s14] sm:$0xff]  ;;  %s467_s14 = scalar_lea.vmem %s1380_s6, %s1268_s17 }
  0x22   : > { %537 = vmatpush.bf16.msra.mxu1 %v924_v1  ;;  %v472_v4 = vld [vmem:[%s443_s30] sm:$0xff]  ;;  %v926_v18 = vld [vmem:[%s467_s14 + $0x8] sm:$0xff]  ;;  %s446_s20 = scalar_lea.vmem %s1375_s1, %s1265_s29  ;;  %s470_s29 = scalar_lea.vmem %s1381_s7, %s1262_s28 }
  0x23   : > { %v473_v5 = vpack.c.bf16 %v472_v4, %v472_v4  ;;  %v1004_v7 = vld [vmem:[%s462_s25] ss:$0 sm:$0xff]  ;;  %570 = vmatpush.bf16.msra.mxu2 %v926_v18  ;;  %s1310_s28 = sand.u32 1, %s1112_s10   ;;  %s667_s11 = scalar_lea.hbm %s1382_s8, %s913_s21 }
  0x24   : > { %v925_v19 = vld [vmem:[%s467_s14] sm:$0xff]  ;;  %s872_s17 = sshll.u32 %s1310_s28, 3  ;;  %s671_s15 = sshll.u32 %s667_s11, 4  ;;  %s672_s15 = int_to_ptr.hbm [resolvable:$true] %s671_s15 }
  0x25   : > { %505 = vmatpush.bf16.msra.mxu0 %v921_v2  ;;  %v580_v20 = vld [vmem:[%s446_s20] sm:$0x1]  ;;  %s432_s24 = scalar_lea.vmem [#allocation2], %s872_s17  ;;  %s650_s19 = scalar_lea.sflag [#allocation3], %s1310_s28 }
  0x26   : > { %538 = vmatpush.bf16.msra.mxu1 %v923_v3  ;;  %v581_v21 = vsub.f32 1.0, %v580_v20  ;;  %v1005_v32 = vld [vmem:[%s470_s29] ss:$0 sm:$0xff]  ;;  %s669_s14 = sshll.u32 %s432_s24, 4  ;;  %s1024_s20 = sshra.s32 %s672_s15, 4  ;;  %s670_s14 = int_to_ptr.vmem [resolvable:$true] %s669_s14  ;;  %s1025_s20 = int_to_ptr.hbm [resolvable:$true] %s1024_s20 }
  0x27   : > { %571 = vmatpush.bf16.msra.mxu2 %v925_v19  ;;  %s1026_s23 = scalar_lea.hbm %s1025_s20, 8  ;;  %s1030_s12 = scalar_lea.hbm %s1382_s8, 64 }
  0x28   : > { %889 = vmatmul.msk.bf16.vlgmr.msra.gmra.mxu0 %vm494_vm0, %v473_v5  ;;  %v582_v23 = vmul.f32 -10000.0, %v581_v21  ;;  %p1027_p0 = scmp.ne.s32.totalorder %s1025_s20, %s1026_s23  ;;  %p1031_p4 = scmp.lt.s32.totalorder %s1025_s20, %s1382_s8 }
  0x29   : > { %898 = vmatmul.msk.bf16.vlgmr.msra.gmra.mxu1 %vm494_vm0, %v473_v5  ;;  %p1032_p5 = scmp.lt.s32.totalorder %s1030_s12, %s1026_s23 }
  0x2a   : > { %907 = vmatmul.msk.bf16.vlgmr.msra.gmra.mxu2 %vm494_vm0, %v473_v5  ;;  %v584_v26 = vperm.slane %v582_v23, 0  ;;  %p1028_p1 = pnand %p1027_p0, %p1239_p3 }
  0x2b   : > { %p1033_p6 = por %p1032_p5, %p1031_p4 }
  0x2c   : > { %p1029_p2 = pneg %p1028_p1 }
  0x2e   : > { %p1034_p7 = pnand %p1033_p6, %p1029_p2 }
  0xa5   : > { %v507_v8 = vpop.f32.mrf.mxu0 }
  0xa6   : > { %v540_v9 = vpop.f32.mrf.mxu1  ;;  %v508_v10 = vadd.f32 %v1003_v6, %v507_v8 }
  0xa7   : > { %v541_v11 = vadd.f32 %v1004_v7, %v540_v9 }
  0xa8   : > { %v577_v13 = vmul.f32 0.17677669, %v508_v10 }
  0xa9   : > { %v579_v12 = vpack.c.bf16 %v541_v11, %v541_v11 }
  0xaa   : > { %v578_v17 = vpack.c.bf16 %v577_v13, %v577_v13 }
  0xab   : > { %v591_v14 = vsel %vm586_vm1, %v579_v12, 0 }
  0xac   : > { %600 = vmatpush.bf16.xpose.msra.mxu3 %v591_v14 }
  0xad   : > { %v509_v15 = vpop.f32.mrf.mxu0  ;;  %v573_v33 = vpop.f32.mrf.mxu2 }
  0xae   : > { %v542_v16 = vpop.f32.mrf.mxu1  ;;  %v574_v34 = vadd.f32 %v1005_v32, %v573_v33 }
  0xb0   : > { %v625_v35 = vpack.c.bf16 %v574_v34, %v574_v34 }
  0xb2   : > { %v631_v38 = vsel %vm629_vm3, %v625_v35, 0 }
  0xb3   : > { %908 = vmatmul.msk.bf16.vlgmr.msra.gmra.mxu3 %vm586_vm1, %v578_v17  ;;  %640 = vmatpush.bf16.msrb.mxu0 %v631_v38 }
  0xb5   : > { %v575_v40 = vpop.f32.mrf.mxu2 }
 0x136   : > { %v602_v27 = vpop.f32.mrf.mxu3 }
 0x137   : > { %v603_v28 = vadd.f32 %v602_v27, %v584_v26 }
 0x139   : > { %v611_v29 = vsel %vm610_vm2, %v603_v28, -10000.0 }
 0x13a   : > { %v612_v30 = vsel %vm586_vm1, %v611_v29, -inf }
 0x13b   : > { %613 = vmax.xlane.f32.xlu0 %v612_v30 }
 0x13e   : > { %v604_v31 = vpop.f32.mrf.mxu3 }
 0x1ae   : > { %v614_v36 = vpop.xlane.xlu0 %613 }
 0x1af   : > { %v615_v37 = vsub.f32 %v611_v29, %v614_v36 }
 0x1b1   : > { %v616_v39 = vmul.f32 1.442695, %v615_v37 }
 0x1b3   : > { %1006 = vpow2.f32 %v616_v39 }
 0x1b9   : > { %v1007_v41 = vpop.eup %1006 }
 0x1ba   : > { %v618_v42 = vsel %vm586_vm1, %v1007_v41, 0.0 }
 0x1bb   : > { %619 = vadd.xlane.f32.xlu0 %v618_v42 }
 0x22e   : > { %v620_v43 = vpop.xlane.xlu0 %619 }
 0x22f   : > { %1008 = vrcp.f32 %v620_v43 }
 0x235   : > { %v1009_v44 = vpop.eup %1008 }
 0x236   : > { %v622_v45 = vmul.f32 %v1009_v44, %v1007_v41 }
 0x238   : > { %v624_v46 = vpack.c.bf16 %v622_v45, %v622_v45  ;;  %623 = vst.msk [vmem:[%s432_s24] sm:$0xff] %vm586_vm1, %v622_v45 }
 0x23a   : > { %909 = vmatmul.msk.bf16.vlgmr.msrb.gmra.mxu0 %vm586_vm1, %v624_v46 }
 0x23b   : > { %1037 = shalt.err (!%p1034_p7)
}
 0x23c   : > { %927 = dma.vmem_to_hbm [thread:$0]  (%p1239_p3), %s670_s14, 128, %s672_s15, %s650_s19   ;;  %vm647_vm4 = vcmask 60416  }
 0x23d   : > { %s915_s24 = sshll.u32 %s665_s18, 2  ;;  %s873_s26 = sshll.u32 %s1310_s28, 2 }
 0x23e   : > { %s683_s30 = scalar_lea.hbm %s1383_s9, %s915_s24  ;;  %s439_s11 = scalar_lea.vmem [#allocation4], %s873_s26 }
 0x23f   : > { %s685_s13 = sshll.u32 %s439_s11, 4  ;;  %s687_s27 = sshll.u32 %s683_s30, 4  ;;  %s686_s13 = int_to_ptr.vmem [resolvable:$true] %s685_s13  ;;  %s688_s27 = int_to_ptr.hbm [resolvable:$true] %s687_s27 }
 0x240   : > { %s655_s20 = scalar_lea.sflag [#allocation5], %s1310_s28  ;;  %s1052_s23 = sshra.s32 %s688_s27, 4  ;;  %s1053_s23 = int_to_ptr.hbm [resolvable:$true] %s1052_s23 }
 0x241   : > { %s1054_s14 = scalar_lea.hbm %s1053_s23, 4  ;;  %s1058_s19 = scalar_lea.hbm %s1383_s9, 32 }
 0x242   : > { %p1055_p9 = scmp.ne.s32.totalorder %s1053_s23, %s1054_s14  ;;  %p1059_p12 = scmp.lt.s32.totalorder %s1053_s23, %s1383_s9 }
 0x243   : > { %p1060_p13 = scmp.lt.s32.totalorder %s1058_s19, %s1054_s14 }
 0x244   : > { %p1056_p10 = pnand %p1055_p9, %p1239_p3 }
 0x245   : > { %p1061_p0 = por %p1060_p13, %p1059_p12 }
 0x246   : > { %p1057_p11 = pneg %p1056_p10 }
 0x248   : > { %p1062_p1 = pnand %p1061_p0, %p1057_p11 }
 0x2b7   : > { %v642_v47 = vpop.f32.mrf.mxu0 }
 0x2b8   : > { %v646_v48 = vpack.c.bf16 %v642_v47, %v642_v47 }
 0x2ba   : > { %648 = vst.msk [vmem:[%s439_s11] sm:$0xf] %vm647_vm4, %v646_v48 }
 0x2bb   : > { %1065 = shalt.err (!%p1062_p1)
}
 0x2bc   : > { %928 = dma.vmem_to_hbm [thread:$0]  (%p1239_p3), %s686_s13, 64, %s688_s27, %s655_s20  }
 0x2bf   : > { %v644_v49 = vpop.f32.mrf.mxu0 }
 0x2c0 PF: > { %s1401_s28 = sld [smem:[#allocation8_spill]]  ;;  %p938_p2 = scmp.ge.s32.totalorder %s1136_s16, 2 }
 0x2c2   : > { %p932_p4 = pnand %p938_p2, %p1248_p8 }
 0x2c4   : > { %p933_p5 = pneg %p932_p4 }
 0x2c6   : > { %s699_s24 = sand.u32 1, %s1401_s28  }
 0x2c7   : > { %s700_s26 = scalar_lea.sflag [#allocation3], %s699_s24 }
 0x2c8   : > { %1099 = dma.done.wait (%p933_p5), %s700_s26, 128  }
 0x2c9   : > { %1101 = vsyncadd (%p933_p5), %s700_s26, 4294967168  ;;  %s710_s21 = scalar_lea.sflag [#allocation5], %s699_s24 }
 0x2ca   : > { %1103 = dma.done.wait (%p933_p5), %s710_s21, 64  }
 0x2cb   : > { %1105 = vsyncadd (%p933_p5), %s710_s21, 4294967232  ;;  %s26_s16 = sadd.s32 1, %s1136_s16   ;;  %s1403_s22 = sld [smem:[#allocation9_spill]] }
 0x2cc   : > { %p23_p6 = scmp.ge.s32.totalorder %s26_s16, 10   ;;  %s1404_s11 = sld [smem:[#allocation15_spill]] }
 0x2cd   : > { %s1405_s12 = sld [smem:[#allocation10_spill]]  ;;  %s1409_s30 = smov %s1112_s10 }
 0x2ce   : > { %s1406_s13 = sld [smem:[#allocation11_spill]]  ;;  %25 = sbr.rel (!%p23_p6) target bundleno = 7 (0x7), region = 125 }
 0x2cf   : > { %s1407_s14 = sld [smem:[#allocation12_spill]] }
 0x2d0   : > { %s1408_s15 = sld [smem:[#allocation13_spill]] }
 0x2d1   : > { %s1410_s10 = smov %s1403_s22 }
 0x2d3   :  { %716 = vsyncpa [#allocation3], 1 }
 0x2d4   :  { %718 = vsyncpa [#allocation3 + $0x1], 1 }
 0x2d5   :  { %719 = vsyncpa [#allocation5], 1 }
 0x2d6   :  { %721 = vsyncpa [#allocation5 + $0x1], 1 }

</bundles_post_ra>
